<compile_context>
chip_gen: v6e
topology: v6e:2x2x1
jax: 0.10.0
libtpu: 0.0.40
codegen_flags: <defaults>
</compile_context>

<pallas_src>
import jax
import jax.numpy as jnp
from jax.experimental import pallas as pl
from jax.experimental.pallas import tpu as pltpu

LANES = 128
SUBLANES = 8
BLOCK_ELEMS = 8192 * LANES        # elements streamed per grid step (review: 8192 rows)
MAX_FASTPATH_LANES = 32 * 1024    # beyond this last-dim size, use the (rows,128) path


def _vmem_limit_bytes():
    """Scoped-VMEM budget: generous on 128-MiB chips (v5e/v6e), tighter on v7x."""
    try:
        phys = pltpu.get_tpu_info().vmem_capacity_bytes
    except Exception:
        phys = 64 << 20           # assume the smallest (v7x-like) if the query fails
    return (64 << 20) if phys >= (96 << 20) else (48 << 20)


def _as_lane_slab(x):
    """View/reshape `x` as a 2-D (rows, W) slab with W % 128 == 0.

    Fast path: when the trailing dims are already (8,128)-aligned, only the
    leading dims are merged -- a layout-preserving reshape on TPU, so no HBM
    relayout copy is made feeding the (opaque) pallas_call.
    """
    if x.ndim == 2 and x.shape[-1] % LANES == 0 and x.shape[-1] <= MAX_FASTPATH_LANES:
        return x
    if (x.ndim >= 3 and x.shape[-1] % LANES == 0
            and x.shape[-1] <= MAX_FASTPATH_LANES
            and x.shape[-2] % SUBLANES == 0):
        return x.reshape(-1, x.shape[-1])
    # TODO(synk): this flatten can materialize a relayout copy in HBM for
    # awkward trailing dims; if the surrounding HLO shows one, switch to an
    # N-D BlockSpec that collapses only the leading dims.
    flat = x.reshape(-1)
    rem = flat.shape[0] % LANES
    if rem:
        # Zero padding is neutral: pred/true pad -> diff 0, mask pad -> False.
        flat = jnp.pad(flat, (0, LANES - rem))
    return flat.reshape(-1, LANES)


def _make_kernel(rows, block_rows, has_mask):
    needs_tail = (rows % block_rows) != 0

    def kernel(*refs):
        if has_mask:
            p_ref, t_ref, m_ref, sq_ref, ct_ref = refs
        else:
            p_ref, t_ref, sq_ref = refs
        step = pl.program_id(0)

        @pl.when(step == 0)
        def _init():
            sq_ref[...] = jnp.zeros_like(sq_ref)
            if has_mask:
                ct_ref[...] = jnp.zeros_like(ct_ref)

        # Stream in native dtype, do arithmetic in f32.
        d = p_ref[...].astype(jnp.float32) - t_ref[...].astype(jnp.float32)
        sq = d * d

        valid = None
        if needs_tail:
            # grid = cdiv(rows, block_rows): zero rows past the end of the
            # array in the final step (OOB block contents are undefined).
            row = (jax.lax.broadcasted_iota(jnp.int32, sq.shape, 0)
                   + step * block_rows)
            valid = row < rows

        if has_mask:
            m = m_ref[...]                          # native bool (or numeric) mask
            keep = m if m.dtype == jnp.bool_ else (m != 0)
            if valid is not None:
                keep = jnp.logical_and(keep, valid)
            # where (not multiply): NaN/Inf in masked-out / out-of-range
            # elements must not poison the sums (torch never touches them).
            sq_ref[...] += jnp.sum(jnp.where(keep, sq, 0.0), keepdims=True)
            ct_ref[...] += jnp.sum(keep.astype(jnp.float32), keepdims=True)
        else:
            if valid is not None:
                sq = jnp.where(valid, sq, 0.0)
            sq_ref[...] += jnp.sum(sq, keepdims=True)

    return kernel


def _reduce_sums(p2, t2, m2, block_elems):
    """Stream the slabs once; return ((1,1) sum_sq [, (1,1) count]) scalars."""
    has_mask = m2 is not None
    rows, width = p2.shape
    inputs = (p2, t2, m2) if has_mask else (p2, t2)

    max_rows = max(SUBLANES, (block_elems // width) // SUBLANES * SUBLANES)
    block_rows = rows if rows <= max_rows else max_rows
    nsteps = pl.cdiv(rows, block_rows)

    in_spec = pl.BlockSpec((block_rows, width), lambda i: (i, 0))
    # Constant output index map -> the (1,1) accumulators stay resident in
    # VMEM across the whole ("arbitrary") reduction axis.
    acc_spec = pl.BlockSpec((1, 1), lambda i: (0, 0))
    n_out = 2 if has_mask else 1

    bytes_accessed = sum(int(a.size) * a.dtype.itemsize for a in inputs) + 4 * n_out
    return pl.pallas_call(
        _make_kernel(rows, block_rows, has_mask),
        out_shape=tuple(jax.ShapeDtypeStruct((1, 1), jnp.float32)
                        for _ in range(n_out)),
        grid_spec=pltpu.PrefetchScalarGridSpec(
            num_scalar_prefetch=0,
            grid=(nsteps,),
            in_specs=[in_spec] * len(inputs),
            out_specs=tuple(acc_spec for _ in range(n_out)),
        ),
        compiler_params=pltpu.CompilerParams(
            dimension_semantics=("arbitrary",),
            vmem_limit_bytes=_vmem_limit_bytes(),
        ),
        cost_estimate=pl.CostEstimate(
            flops=4 * int(p2.size),
            transcendentals=0,
            bytes_accessed=int(bytes_accessed),
        ),
    )(*inputs)


def masked_mse_loss(y_pred, y_true, mask=None, *, block_elems=BLOCK_ELEMS):
    """JAX/Pallas equivalent of MaskedMSELoss(reduction='mean').forward."""
    y_pred = jnp.asarray(y_pred)
    y_true = jnp.asarray(y_true)
    n = int(y_pred.size)

    p2 = _as_lane_slab(y_pred)
    t2 = _as_lane_slab(y_true)
    m2 = None
    if mask is not None:
        mask = jnp.asarray(mask)
        if mask.shape != y_pred.shape:        # torch.masked_select broadcasts
            mask = jnp.broadcast_to(mask, y_pred.shape)
        m2 = _as_lane_slab(mask)              # streamed in native (bool) dtype

    parts = _reduce_sums(p2, t2, m2, block_elems)
    if mask is not None:
        return parts[0][0, 0] / parts[1][0, 0]   # 0/0 -> NaN, same as torch
    return parts[0][0, 0] / jnp.float32(n)


if __name__ == "__main__":
    key = jax.random.PRNGKey(0)
    k1, k2, k3, k4, k5, k6, k7, k8 = jax.random.split(key, 8)

    # --- Case 1: masked, f32, NCHW (2, 4, 16, 16) ---
    shape = (2, 4, 16, 16)
    y_pred = jax.random.normal(k1, shape, dtype=jnp.float32)
    y_true = jax.random.normal(k2, shape, dtype=jnp.float32)
    mask = jax.random.bernoulli(k3, p=0.7, shape=shape)

    loss1 = jax.block_until_ready(masked_mse_loss(y_pred, y_true, mask))
    ref1 = jnp.sum(jnp.where(mask, (y_pred - y_true) ** 2, 0.0)) / jnp.sum(
        mask.astype(jnp.float32))
    assert jnp.allclose(loss1, ref1, rtol=1e-5, atol=1e-6), (loss1, ref1)

    # --- Case 2: mask=None (plain MSE) ---
    loss2 = jax.block_until_ready(masked_mse_loss(y_pred, y_true, None))
    ref2 = jnp.mean((y_pred - y_true) ** 2)
    assert jnp.allclose(loss2, ref2, rtol=1e-5, atol=1e-6), (loss2, ref2)

    # --- Case 2b: mask=None, forced multi-step accumulation (small blocks) ---
    loss2b = jax.block_until_ready(
        masked_mse_loss(y_pred, y_true, None, block_elems=8 * LANES))
    assert jnp.allclose(loss2b, ref2, rtol=1e-5, atol=1e-6), (loss2b, ref2)

    # --- Case 3: masked, bf16 inputs in native dtype, rows % 8 != 0 ---
    shape3 = (2, 3, 8, 24)  # 1152 elems -> 9 rows of 128
    p3 = jax.random.normal(k4, shape3, dtype=jnp.float32).astype(jnp.bfloat16)
    t3 = jax.random.normal(k5, shape3, dtype=jnp.float32).astype(jnp.bfloat16)
    m3 = jax.random.bernoulli(k6, p=0.5, shape=shape3)
    loss3 = jax.block_until_ready(masked_mse_loss(p3, t3, m3))
    d3 = p3.astype(jnp.float32) - t3.astype(jnp.float32)
    ref3 = jnp.sum(jnp.where(m3, d3 * d3, 0.0)) / jnp.sum(m3.astype(jnp.float32))
    assert jnp.allclose(loss3, ref3, rtol=1e-5, atol=1e-6), (loss3, ref3)

    # --- Case 4: numel not a multiple of 128 (lane-pad path), f32 ---
    shape4 = (2, 3, 5, 7)  # 210 elems
    p4 = jax.random.normal(k1, shape4, dtype=jnp.float32)
    t4 = jax.random.normal(k2, shape4, dtype=jnp.float32)
    m4 = jax.random.bernoulli(k3, p=0.6, shape=shape4)
    loss4 = jax.block_until_ready(masked_mse_loss(p4, t4, m4))
    ref4 = jnp.sum(jnp.where(m4, (p4 - t4) ** 2, 0.0)) / jnp.sum(
        m4.astype(jnp.float32))
    assert jnp.allclose(loss4, ref4, rtol=1e-5, atol=1e-6), (loss4, ref4)

    # --- Case 5: layout-free fast path (trailing dims (8, 256) aligned) ---
    shape5 = (4, 8, 256)
    p5 = jax.random.normal(k4, shape5, dtype=jnp.float32)
    t5 = jax.random.normal(k5, shape5, dtype=jnp.float32)
    loss5 = jax.block_until_ready(masked_mse_loss(p5, t5, None))
    ref5 = jnp.mean((p5 - t5) ** 2)
    assert jnp.allclose(loss5, ref5, rtol=1e-5, atol=1e-6), (loss5, ref5)

    # --- Case 6: small shapes but multi-step grid + in-kernel row tail ---
    shape6 = (5, 9, 128)  # 45 rows; 16-row blocks -> 3 steps with a 13-row tail
    p6 = jax.random.normal(k7, shape6, dtype=jnp.float32)
    t6 = jax.random.normal(k8, shape6, dtype=jnp.float32)
    m6 = jax.random.bernoulli(k6, p=0.4, shape=shape6)
    loss6 = jax.block_until_ready(
        masked_mse_loss(p6, t6, m6, block_elems=16 * LANES))
    ref6 = jnp.sum(jnp.where(m6, (p6 - t6) ** 2, 0.0)) / jnp.sum(
        m6.astype(jnp.float32))
    assert jnp.allclose(loss6, ref6, rtol=1e-5, atol=1e-6), (loss6, ref6)

    # --- Case 7: default 8192-row blocks, multi-step + tail (16800 rows) ---
    shape7 = (3, 700, 1024)
    p7 = jax.random.normal(k7, shape7, dtype=jnp.float32)
    t7 = jax.random.normal(k8, shape7, dtype=jnp.float32)
    m7 = jax.random.bernoulli(k3, p=0.3, shape=shape7)
    loss7 = jax.block_until_ready(masked_mse_loss(p7, t7, m7))
    ref7 = jnp.sum(jnp.where(m7, (p7 - t7) ** 2, 0.0)) / jnp.sum(
        m7.astype(jnp.float32))
    assert jnp.allclose(loss7, ref7, rtol=1e-4, atol=1e-6), (loss7, ref7)

    print("KERNEL_OK")
</pallas_src>

<mosaic_0001>
module attributes {stable_mosaic.version = 11 : i64} {
  func.func @kernel(%arg0: i32, %arg1: memref<16x128xf32, #tpu.memory_space<vmem>>, %arg2: memref<16x128xf32, #tpu.memory_space<vmem>>, %arg3: memref<16x128xi32, #tpu.memory_space<vmem>>, %arg4: memref<1x1xf32, #tpu.memory_space<vmem>>, %arg5: memref<1x1xf32, #tpu.memory_space<vmem>>) attributes {dimension_semantics = [#tpu.dimension_semantics<arbitrary>], iteration_bounds = array<i64: 1>, scalar_prefetch = 0 : i64, scratch_operands = 0 : i64, tpu.core_type = #tpu.core_type<tc>, window_params = [{transform_indices = @transform_0, window_bounds = array<i64: 16, 128>}, {transform_indices = @transform_1, window_bounds = array<i64: 16, 128>}, {transform_indices = @transform_2, window_bounds = array<i64: 16, 128>}, {pipeline_mode = #tpu.pipeline_mode<synchronous>, transform_indices = @transform_3, window_bounds = array<i64: 1, 1>}, {pipeline_mode = #tpu.pipeline_mode<synchronous>, transform_indices = @transform_4, window_bounds = array<i64: 1, 1>}]} {
    %c0_i32 = arith.constant 0 : i32
    %0 = arith.cmpi eq, %arg0, %c0_i32 : i32
    %1 = arith.extui %0 : i1 to i32
    %c0_i32_0 = arith.constant 0 : i32
    %2 = arith.cmpi ne, %1, %c0_i32_0 : i32
    scf.if %2 {
      %cst_17 = arith.constant 0.000000e+00 : f32
      %29 = vector.broadcast %cst_17 : f32 to vector<1x1xf32>
      %c0_18 = arith.constant 0 : index
      %c0_19 = arith.constant 0 : index
      %30 = vector.load %arg4[%c0_18, %c0_19] : memref<1x1xf32, #tpu.memory_space<vmem>>, vector<1x1xf32>
      tpu.vector_store %arg4[%c0_18, %c0_19], %29 {strides = array<i32>} : memref<1x1xf32, #tpu.memory_space<vmem>>, vector<1x1xf32>,
      %cst_20 = arith.constant 0.000000e+00 : f32
      %31 = vector.broadcast %cst_20 : f32 to vector<1x1xf32>
      %c0_21 = arith.constant 0 : index
      %c0_22 = arith.constant 0 : index
      %32 = vector.load %arg5[%c0_21, %c0_22] : memref<1x1xf32, #tpu.memory_space<vmem>>, vector<1x1xf32>
      tpu.vector_store %arg5[%c0_21, %c0_22], %31 {strides = array<i32>} : memref<1x1xf32, #tpu.memory_space<vmem>>, vector<1x1xf32>,
    } else {
    }
    %c0 = arith.constant 0 : index
    %c0_1 = arith.constant 0 : index
    %3 = vector.load %arg1[%c0, %c0_1] : memref<16x128xf32, #tpu.memory_space<vmem>>, vector<16x128xf32>
    %c0_2 = arith.constant 0 : index
    %c0_3 = arith.constant 0 : index
    %4 = vector.load %arg2[%c0_2, %c0_3] : memref<16x128xf32, #tpu.memory_space<vmem>>, vector<16x128xf32>
    %5 = arith.subf %3, %4 : vector<16x128xf32>
    %6 = arith.mulf %5, %5 : vector<16x128xf32>
    %c0_4 = arith.constant 0 : index
    %c0_5 = arith.constant 0 : index
    %7 = vector.load %arg3[%c0_4, %c0_5] : memref<16x128xi32, #tpu.memory_space<vmem>>, vector<16x128xi32>
    %cst = arith.constant dense<0> : vector<16x128xi32>
    %8 = arith.cmpi ne, %7, %cst : vector<16x128xi32>
    %c0_6 = arith.constant 0 : index
    %c0_7 = arith.constant 0 : index
    %9 = vector.load %arg4[%c0_6, %c0_7] : memref<1x1xf32, #tpu.memory_space<vmem>>, vector<1x1xf32>
    %cst_8 = arith.constant 0.000000e+00 : f32
    %10 = vector.broadcast %cst_8 : f32 to vector<16x128xf32>
    %11 = arith.select %8, %6, %10 : vector<16x128xi1>, vector<16x128xf32>
    %12 = vector.shape_cast %11 : vector<16x128xf32> to vector<1x16x128xf32>
    %cst_9 = arith.constant dense<0.000000e+00> : vector<1xf32>
    %13 = vector.multi_reduction <add>, %12, %cst_9 [1, 2] : vector<1x16x128xf32> to vector<1xf32>
    %14 = vector.shape_cast %13 : vector<1xf32> to vector<1x1x1xf32>
    %15 = vector.extract %14[0, 0, 0] : f32 from vector<1x1x1xf32>
    %16 = vector.broadcast %15 : f32 to vector<1x1xf32>
    %17 = arith.addf %9, %16 : vector<1x1xf32>
    %c0_10 = arith.constant 0 : index
    %c0_11 = arith.constant 0 : index
    %18 = vector.load %arg4[%c0_10, %c0_11] : memref<1x1xf32, #tpu.memory_space<vmem>>, vector<1x1xf32>
    tpu.vector_store %arg4[%c0_10, %c0_11], %17 {strides = array<i32>} : memref<1x1xf32, #tpu.memory_space<vmem>>, vector<1x1xf32>,
    %c0_12 = arith.constant 0 : index
    %c0_13 = arith.constant 0 : index
    %19 = vector.load %arg5[%c0_12, %c0_13] : memref<1x1xf32, #tpu.memory_space<vmem>>, vector<1x1xf32>
    %20 = arith.extui %8 : vector<16x128xi1> to vector<16x128xi32>
    %21 = arith.sitofp %20 : vector<16x128xi32> to vector<16x128xf32>
    %22 = vector.shape_cast %21 : vector<16x128xf32> to vector<1x16x128xf32>
    %cst_14 = arith.constant dense<0.000000e+00> : vector<1xf32>
    %23 = vector.multi_reduction <add>, %22, %cst_14 [1, 2] : vector<1x16x128xf32> to vector<1xf32>
    %24 = vector.shape_cast %23 : vector<1xf32> to vector<1x1x1xf32>
    %25 = vector.extract %24[0, 0, 0] : f32 from vector<1x1x1xf32>
    %26 = vector.broadcast %25 : f32 to vector<1x1xf32>
    %27 = arith.addf %19, %26 : vector<1x1xf32>
    %c0_15 = arith.constant 0 : index
    %c0_16 = arith.constant 0 : index
    %28 = vector.load %arg5[%c0_15, %c0_16] : memref<1x1xf32, #tpu.memory_space<vmem>>, vector<1x1xf32>
    tpu.vector_store %arg5[%c0_15, %c0_16], %27 {strides = array<i32>} : memref<1x1xf32, #tpu.memory_space<vmem>>, vector<1x1xf32>,
    return
  }
  func.func @transform_0(%arg0: i32) -> (i32, i32) {
    %c0_i32 = arith.constant 0 : i32
    %c0_i32_0 = arith.constant 0 : i32
    return %arg0, %c0_i32 : i32, i32
  }
  func.func @transform_1(%arg0: i32) -> (i32, i32) {
    %c0_i32 = arith.constant 0 : i32
    %c0_i32_0 = arith.constant 0 : i32
    return %arg0, %c0_i32 : i32, i32
  }
  func.func @transform_2(%arg0: i32) -> (i32, i32) {
    %c0_i32 = arith.constant 0 : i32
    %c0_i32_0 = arith.constant 0 : i32
    return %arg0, %c0_i32 : i32, i32
  }
  func.func @transform_3(%arg0: i32) -> (i32, i32) {
    %c0_i32 = arith.constant 0 : i32
    %c0_i32_0 = arith.constant 0 : i32
    %c0_i32_1 = arith.constant 0 : i32
    return %c0_i32, %c0_i32_0 : i32, i32
  }
  func.func @transform_4(%arg0: i32) -> (i32, i32) {
    %c0_i32 = arith.constant 0 : i32
    %c0_i32_0 = arith.constant 0 : i32
    %c0_i32_1 = arith.constant 0 : i32
    return %c0_i32, %c0_i32_0 : i32, i32
  }
}

</mosaic_0001>

<bundles_post_ra>
// kernel: tpu_custom_call.1
= control target key start
LH: loop header
LB: loop body
LE: loop exit
PB: predicated region body
PF: predicated region fallthrough
CT: control target
= control target key end

     0   :  { %10 = vsyncpa [#allocation3], 0  ;;  %s249_s0 = inlined_call_operand.vmem [shape: f32[16,128], index: 0, kind: input, shape index: {}]   ;;  %s250_s1 = inlined_call_operand.hbm [shape: f32[16,128], index: 1, kind: input, shape index: {}]   ;;  %s251_s2 = inlined_call_operand.vmem [shape: s32[16,128], index: 2, kind: input, shape index: {}]   ;;  %s252_s3 = inlined_call_operand.hbm [shape: f32[1,1], index: 3, kind: output, shape index: {0}]   ;;  %s253_s4 = inlined_call_operand.hbm [shape: f32[1,1], index: 4, kind: output, shape index: {1}]  }
   0x1   :  { %11 = vsyncpa [#allocation4], 0 }
   0x2   :  { %12 = vsyncpa [#allocation7], 0  ;;  %s193_s15 = smov [#allocation2]  }
   0x3   :  { %s20_s16 = sshll.u32 %s193_s15, 4  ;;  %s21_s16 = int_to_ptr.vmem [resolvable:$true] %s20_s16 }
   0x4   :  { %s135_s17 = scalar_lea.vmem %s21_s16, 256  ;;  %p140_p1 = scmp.lt.s32.totalorder %s21_s16, %s21_s16 }
   0x5   :  { %p136_p0 = scmp.ne.s32.totalorder %s21_s16, %s135_s17  ;;  %p141_p2 = scmp.lt.s32.totalorder %s135_s17, %s135_s17 }
   0x7   :  { %p142_p3 = por %p141_p2, %p140_p1 }
   0x9   :  { %p143_p4 = pnand %p142_p3, %p136_p0 }
   0xb   :  { %146 = shalt.err (!%p143_p4)
}
   0xc   :  { %s194_s18 = smov 128   ;;  %s195_s19 = smov 8  }
   0xd   :  { %26 = dma.hbm_to_vmem [thread:$0]  %s250_s1, 256, %s21_s16, [#allocation3], %s194_s18, %s194_s18, %s195_s19  }
   0xe   :  { %187 = dma.done.wait [#allocation3], 256  }
   0xf   :  { %188 = vsyncadd [#allocation3], 4294967040  ;;  %vm36_vm0 = vcmask 0   ;;  %v196_v0 = vmov 0.0   ;;  %v39_v1 = vld [vmem:[%s249_s0] sm:$0xff]  ;;  %v40_v2 = vld [vmem:[%s249_s0 + $0x8] sm:$0xff] }
  0x10   :  { %37 = vst.msk [vmem:[#allocation5] sm:$0x1] %vm36_vm0, %v196_v0  ;;  %38 = vst.msk [vmem:[#allocation6] sm:$0x1] %vm36_vm0, %v196_v0  ;;  %v41_v3 = vld [vmem:[#allocation2] sm:$0xff]  ;;  %v42_v4 = vld [vmem:[#allocation2 + $0x8] sm:$0xff] }
  0x11   :  { %v43_v5 = vsub.f32 %v39_v1, %v41_v3  ;;  %v47_v6 = vld [vmem:[%s251_s2] sm:$0xff]  ;;  %v48_v7 = vld [vmem:[%s251_s2 + $0x8] sm:$0xff]  ;;  %v44_v8 = vsub.f32 %v40_v2, %v42_v4  ;;  %s197_s0 = smov [#allocation5]   ;;  %s198_s30 = smov [#allocation6]  }
  0x12   :  { %vm49_vm1 = vcmp.ne.s32.totalorder %v47_v6, 0  ;;  %vm50_vm2 = vcmp.ne.s32.totalorder %v48_v7, 0  ;;  %s92_s2 = sshll.u32 %s197_s0, 4  ;;  %s102_s5 = sshll.u32 %s198_s30, 4  ;;  %s93_s2 = int_to_ptr.vmem [resolvable:$true] %s92_s2  ;;  %s103_s5 = int_to_ptr.vmem [resolvable:$true] %s102_s5 }
  0x13   :  { %v45_v9 = vmul.f32 %v43_v5, %v43_v5  ;;  %v46_v10 = vmul.f32 %v44_v8, %v44_v8  ;;  %v115_v13 = vsel %vm49_vm1, 1.0, %v196_v0  ;;  %v116_v14 = vsel %vm50_vm2, 1.0, %v196_v0  ;;  %s147_s7 = scalar_lea.vmem %s93_s2, 16  ;;  %s151_s8 = scalar_lea.vmem %s93_s2, 32 }
  0x14   :  { %v73_v16 = vadd.f32 %v116_v14, %v115_v13  ;;  %p148_p5 = scmp.ne.s32.totalorder %s93_s2, %s147_s7  ;;  %p152_p6 = scmp.lt.s32.totalorder %s93_s2, %s93_s2 }
  0x15   :  { %v52_v11 = vsel %vm49_vm1, %v45_v9, 0.0  ;;  %v53_v12 = vsel %vm50_vm2, %v46_v10, 0.0  ;;  %p153_p7 = scmp.lt.s32.totalorder %s151_s8, %s147_s7 }
  0x16   :  { %v54_v15 = vadd.f32 %v53_v12, %v52_v11 }
  0x17   :  { %v51_v31 = vld [vmem:[#allocation5] sm:$0x1]  ;;  %v68_v34 = vld [vmem:[#allocation6] sm:$0x1]  ;;  %p154_p8 = por %p153_p7, %p152_p6 }
  0x18   :  { %55 = vadd.xlane.f32.xlu0 %v54_v15 }
  0x19   :  { %p155_p9 = pnand %p154_p8, %p148_p5 }
  0x1c   :  { %74 = vadd.xlane.f32.xlu0 %v73_v16 }
  0xa1   :  { %v56_v17 = vpop.xlane.xlu0 %55 }
  0xa2   :  { %v57_v18 = vrot.slane %v56_v17, 4 }
  0xa4   :  { %v58_v19 = vadd.f32 %v57_v18, %v56_v17 }
  0xa5   :  { %v75_v20 = vpop.xlane.xlu0 %74 }
  0xa6   :  { %v59_v21 = vrot.slane %v58_v19, 2  ;;  %v76_v22 = vrot.slane %v75_v20, 4 }
  0xa8   :  { %v77_v23 = vadd.f32 %v76_v22, %v75_v20  ;;  %v60_v24 = vadd.f32 %v59_v21, %v58_v19 }
  0xaa   :  { %v78_v25 = vrot.slane %v77_v23, 2  ;;  %v61_v26 = vrot.slane %v60_v24, 1 }
  0xac   :  { %v79_v27 = vadd.f32 %v78_v25, %v77_v23  ;;  %v62_v28 = vadd.f32 %v61_v26, %v60_v24 }
  0xae   :  { %117 = vpush %v62_v28  ;;  %v80_v29 = vrot.slane %v79_v27, 1 }
  0xb0   :  { %v81_v30 = vadd.f32 %v80_v29, %v79_v27 }
  0xb2   :  { %119 = vpush %v81_v30 }
  0xdf   :  { %s118_s29 = spop %117 }
  0xe0   :  { %v64_v32 = vstv %s118_s29 }
  0xe1   :  { %v65_v33 = vadd.f32 %v64_v32, %v51_v31 }
  0xe3   :  { %67 = vst.msk [vmem:[#allocation5] sm:$0x1] %vm36_vm0, %v65_v33  ;;  %s120_s6 = spop %119 }
  0xe4   :  { %v83_v35 = vstv %s120_s6 }
  0xe5   :  { %158 = shalt.err (!%p155_p9)
}
  0xe6   :  { %95 = dma.vmem_to_hbm [thread:$0]  %s93_s2, 16, %s252_s3, [#allocation4]   ;;  %v84_v36 = vadd.f32 %v83_v35, %v68_v34 }
  0xe7   :  { %s167_s11 = scalar_lea.vmem %s103_s5, 16  ;;  %s171_s12 = scalar_lea.vmem %s103_s5, 32 }
  0xe8   :  { %85 = vst.msk [vmem:[#allocation6] sm:$0x1] %vm36_vm0, %v84_v36  ;;  %p168_p10 = scmp.ne.s32.totalorder %s103_s5, %s167_s11  ;;  %p172_p11 = scmp.lt.s32.totalorder %s103_s5, %s103_s5 }
  0xe9   :  { %p173_p12 = scmp.lt.s32.totalorder %s171_s12, %s167_s11 }
  0xeb   :  { %p174_p13 = por %p173_p12, %p172_p11 }
  0xed   :  { %p175_p0 = pnand %p174_p13, %p168_p10 }
  0xef   :  { %178 = shalt.err (!%p175_p0)
}
  0xf0   :  { %105 = dma.vmem_to_hbm [thread:$0]  %s103_s5, 16, %s253_s4, [#allocation7]  }
  0xf1   :  { %189 = dma.done.wait [#allocation4], 16  }
  0xf2   :  { %190 = vsyncadd [#allocation4], 4294967280 }
  0xf3   :  { %191 = dma.done.wait [#allocation7], 16  }
  0xf4   :  { %192 = vsyncadd [#allocation7], 4294967280 }
  0xf5   :  { %112 = vsyncpa [#allocation3], 1 }
  0xf6   :  { %113 = vsyncpa [#allocation4], 1 }
  0xf7   :  { %114 = vsyncpa [#allocation7], 1 }

</bundles_post_ra>
